<compile_context>
chip_gen: v5e
topology: v5e:2x2
jax: 0.10.0
libtpu: 0.0.40
codegen_flags: <defaults>
</compile_context>

<pallas_src>
import math
from functools import partial

import jax
import jax.numpy as jnp
from jax.experimental import pallas as pl
from jax.experimental.pallas import tpu as pltpu


def _round_up(n, m):
    return ((n + m - 1) // m) * m


def _cdiv(a, b):
    return -(-a // b)


def _device_kind():
    try:
        return jax.devices()[0].device_kind.lower()
    except Exception:
        return ""


def _choose_tiles(B, C, E, tile_b, tile_c, kind, mm_itemsize):
    """Generation-aware, (8,128)-aligned, VMEM-safe tile sizes."""
    is_v5 = "v5" in kind
    is_big_vmem = is_v5 or ("v6" in kind)          # 128 MiB VMEM
    is_small_vmem = not is_big_vmem                # v7x / unknown -> 64 MiB, be conservative

    if tile_b is None:
        cap = 128 if is_v5 else 256                # v6e/v7x MXU is 256 wide; v5e is 128
        tile_b = min(_round_up(B, 8), cap)
        # v7x has 2 TensorCores: keep the "parallel" batch axis >= 2 tiles.
        if is_small_vmem and B >= 16 and _cdiv(B, tile_b) < 2:
            tile_b = _round_up(_cdiv(B, 2), 8)
    tile_b = _round_up(max(int(tile_b), 8), 8)

    if tile_c is None:
        # Budget the double-buffered (E, tC) W stream plus ~4 live [tB,tC] f32
        # temporaries.  Generous on v5e/v6e (128 MiB VMEM), tight on v7x (64 MiB).
        w_budget = (8 if is_small_vmem else 24) << 20
        t_budget = (12 if is_small_vmem else 32) << 20
        max_c = min(w_budget // max(1, E * mm_itemsize),
                    t_budget // max(1, tile_b * 16))
        max_c = max(128, (max_c // 128) * 128)
        if C <= max_c:
            tile_c = C
        else:
            tile_c = max_c
            # Prefer a tile that divides C so the padded-class masking compiles out.
            if C % 128 == 0:
                t = tile_c
                while t > 128 and C % t:
                    t -= 128
                tile_c = t
    tile_c = int(tile_c)
    if tile_c >= C:
        tile_c = _round_up(C, 8)                   # single class tile == full lane extent
    else:
        tile_c = max(128, (tile_c // 128) * 128)   # streamed lane-axis blocks: 128-aligned
    return tile_b, tile_c


def _default_vmem_limit(tB, tC, E, mm_itemsize, kind):
    est = (2 * E * tC * mm_itemsize                # double-buffered W stream
           + tB * E * (8 + mm_itemsize)            # x in + x_n out + cast scratch
           + 8 * tB * tC * 4                       # [tB,tC] f32/i32 temporaries headroom
           + (1 << 20))
    big_vmem = ("v5" in kind) or ("v6" in kind)    # 128 MiB physical; v7x/unknown -> 64 MiB
    cap = (120 if big_vmem else 56) << 20
    return int(min(cap, max(32 << 20, 2 * est)))


def _angular_margin_kernel(tgt_ref, x_ref, w_ref,
                           xnorm_ref, preds_ref, ps_ref,
                           scales_sc, cmax_sc, amax_sc, ct_sc, sumexp_sc, xcast_sc,
                           *, scale, m2, m3, eps, C, C_pad, tC, clip):
    k = pl.program_id(1)
    n_c = pl.num_programs(1)

    # ---- first C-tile for this batch tile: normalize x once, init accumulators.
    # Runs once per batch tile (outside the hot (i,k) loop), so exact sqrt /
    # divide is kept here for parity with torch; the hot loop carries no
    # normalization at all (W is pre-normalized in the wrapper).
    @pl.when(k == 0)
    def _init():
        x = x_ref[...].astype(jnp.float32)                          # [tB, E]
        x_norm = jnp.sqrt(jnp.sum(x * x, axis=1, keepdims=True))    # [tB, 1]
        x_n = x / x_norm                                            # no eps (torch)
        xnorm_ref[...] = x_n                                        # written once
        xcast_sc[...] = x_n.astype(xcast_sc.dtype)                  # cast cached once
        if scale is None:
            scales_sc[...] = x_norm
        else:
            scales_sc[...] = jnp.full(scales_sc.shape, float(scale), jnp.float32)
        cmax_sc[...] = jnp.full(cmax_sc.shape, -2.0, jnp.float32)   # < any clipped cos
        amax_sc[...] = jnp.zeros(amax_sc.shape, jnp.int32)
        ct_sc[...] = jnp.zeros(ct_sc.shape, jnp.float32)
        sumexp_sc[...] = jnp.zeros(sumexp_sc.shape, jnp.float32)

    # ---- every C-tile: cos block (NN MXU contraction, pre-normalized W stream),
    # online argmax + logsumexp.
    x_mm = xcast_sc[...]                                            # [tB, E] matmul dtype
    s = scales_sc[...]                                              # [tB, 1]
    w = w_ref[...]                                                  # [E, tC], pre-normalized
    cos = jnp.dot(x_mm, w, preferred_element_type=jnp.float32)      # [tB, tC]
    if clip:
        cos = jnp.clip(cos, -1.0, 1.0)

    col_off = k * tC                                                # scalar offset
    base_col = jax.lax.broadcasted_iota(jnp.int32, cos.shape, 1)    # tile-local columns

    if C_pad != C:                      # mask padded classes (trace-time gate)
        valid = base_col < (C - col_off)
        cos_m = jnp.where(valid, cos, -2.0)
    else:
        valid = None
        cos_m = cos

    # running max / first-occurrence argmax -----------------------------------
    tile_max = jnp.max(cos_m, axis=1, keepdims=True)                # [tB, 1]
    tile_arg = jnp.min(jnp.where(cos_m == tile_max, base_col, tC),
                       axis=1, keepdims=True) + col_off             # offset on reduced only
    cmax_old = cmax_sc[...]
    better = tile_max > cmax_old              # strict > keeps earlier-tile ties
    cmax_new = jnp.maximum(cmax_old, tile_max)
    amax_sc[...] = jnp.where(better, tile_arg, amax_sc[...])
    cmax_sc[...] = cmax_new

    # running sum of exp(s*cos) stabilized at s*cmax ---------------------------
    off_new = s * cmax_new
    e = jnp.exp(s * cos - off_new)                                   # [tB, tC]
    if valid is not None:
        e = jnp.where(valid, e, 0.0)
    tile_sum = jnp.sum(e, axis=1, keepdims=True)
    sumexp_sc[...] = sumexp_sc[...] * jnp.exp(s * cmax_old - off_new) + tile_sum

    # target-column cosine (hit in exactly one C-tile) -------------------------
    onehot = base_col == (tgt_ref[...] - col_off)
    ct_sc[...] += jnp.sum(jnp.where(onehot, cos, 0.0), axis=1, keepdims=True)

    # ---- last C-tile: margin on the target column only, per-sample loss ------
    @pl.when(k == n_c - 1)
    def _finalize():
        preds_ref[...] = amax_sc[...]
        c_t = ct_sc[...]                                             # [tB, 1]
        if not clip:
            c_t = jnp.clip(c_t, -1.0, 1.0)    # target column still clamped
        s_ = scales_sc[...]
        cmax = cmax_sc[...]
        cm = c_t
        if m2 != 0.0:       # cos(theta + m2) via angle addition (m1 == 1 only)
            sin_t = jnp.sqrt(jnp.maximum(1.0 - c_t * c_t, 0.0))
            cm = c_t * math.cos(m2) - sin_t * math.sin(m2)
        if m3 != 0.0:
            cm = cm - m3
        numerator = s_ * cm
        off = s_ * cmax
        # excluded = sum_{j != target} exp(s*cos_j)   (stabilized at off)
        excl = jnp.maximum(sumexp_sc[...] - jnp.exp(s_ * c_t - off), 0.0)
        # log(exp(numerator) + excluded + eps)        (stabilized at off;
        # eps*exp(-off) may underflow for very large scales — negligible)
        log_denom = off + jnp.log(jnp.exp(numerator - off) + excl
                                  + eps * jnp.exp(-off))
        ps_ref[...] = numerator - log_denom


def angular_margin_loss(x, weight, targets, *,
                        scale=None, m1=1, m2=0.0, m3=0.0, eps=1e-6,
                        tile_b=None, tile_c=None,
                        matmul_dtype=jnp.bfloat16, clip_cosines=True,
                        w_buffer_count=None, vmem_limit_bytes=None):
    # TODO(synk): m1 != 1 would need arccos of every cosine in-kernel; only m1 == 1.
    assert m1 == 1, "only m1 == 1 is supported in the Pallas kernel"
    B, E = x.shape
    C, E2 = weight.shape
    assert E2 == E
    if matmul_dtype is None:
        matmul_dtype = jnp.float32
    mm_itemsize = jnp.dtype(matmul_dtype).itemsize
    kind = _device_kind()

    tB, tC = _choose_tiles(B, C, E, tile_b, tile_c, kind, mm_itemsize)
    B_pad = _round_up(B, tB)
    C_pad = _round_up(C, tC)
    nB, nC = B_pad // tB, C_pad // tC

    # ---- one-time wrapper prep (single XLA ops, amortized over nB W re-reads) ----
    # Pre-normalize W rows once (matches F.normalize exactly), transpose to
    # [E, C] and cast to the matmul/stream dtype (bf16 by default): this is the
    # dominant HBM stream and is re-read once per batch tile.
    w32 = weight.astype(jnp.float32)
    w_n = w32 / jnp.maximum(jnp.linalg.norm(w32, axis=1, keepdims=True), 1e-12)
    w_t = w_n.T.astype(matmul_dtype)                                # [E, C]
    if C_pad != C:
        w_t = jnp.pad(w_t, ((0, 0), (0, C_pad - C)))

    x_p = x.astype(jnp.float32)
    if B_pad != B:
        # pad batch rows with a unit basis vector (finite norm, sliced off later)
        pad_rows = jnp.zeros((B_pad - B, E), jnp.float32).at[:, 0].set(1.0)
        x_p = jnp.concatenate([x_p, pad_rows], axis=0)
    tgt = targets.astype(jnp.int32).reshape(B, 1)
    if B_pad != B:
        tgt = jnp.pad(tgt, ((0, B_pad - B), (0, 0)))

    if vmem_limit_bytes is None:
        vmem_limit_bytes = _default_vmem_limit(tB, tC, E, mm_itemsize, kind)

    w_spec_kwargs = {}
    if w_buffer_count is not None:      # deeper W pipelining (v5e/v6e headroom only)
        w_spec_kwargs["pipeline_mode"] = pl.Buffered(int(w_buffer_count))

    kernel = partial(_angular_margin_kernel, scale=scale, m2=float(m2),
                     m3=float(m3), eps=float(eps), C=C, C_pad=C_pad, tC=tC,
                     clip=bool(clip_cosines))

    grid_spec = pltpu.PrefetchScalarGridSpec(
        num_scalar_prefetch=0,
        grid=(nB, nC),
        in_specs=[
            pl.BlockSpec((tB, 1), lambda i, k: (i, 0)),   # targets
            pl.BlockSpec((tB, E), lambda i, k: (i, 0)),   # x (resident across k)
            pl.BlockSpec((E, tC), lambda i, k: (0, k),    # normalized W^T, streamed over C
                         **w_spec_kwargs),
        ],
        out_specs=(
            pl.BlockSpec((tB, E), lambda i, k: (i, 0)),   # normalized inputs
            pl.BlockSpec((tB, 1), lambda i, k: (i, 0)),   # preds
            pl.BlockSpec((tB, 1), lambda i, k: (i, 0)),   # per-sample loss term
        ),
        scratch_shapes=[
            pltpu.VMEM((tB, 1), jnp.float32),   # scales
            pltpu.VMEM((tB, 1), jnp.float32),   # running max cos
            pltpu.VMEM((tB, 1), jnp.int32),     # running argmax
            pltpu.VMEM((tB, 1), jnp.float32),   # target cosine
            pltpu.VMEM((tB, 1), jnp.float32),   # running sum exp
            pltpu.VMEM((tB, E), matmul_dtype),  # x_n cast once for the MXU
        ],
    )

    x_n, preds, per_sample = pl.pallas_call(
        kernel,
        out_shape=(
            jax.ShapeDtypeStruct((B_pad, E), jnp.float32),
            jax.ShapeDtypeStruct((B_pad, 1), jnp.int32),
            jax.ShapeDtypeStruct((B_pad, 1), jnp.float32),
        ),
        grid_spec=grid_spec,
        compiler_params=pltpu.CompilerParams(
            dimension_semantics=("parallel", "arbitrary"),
            vmem_limit_bytes=vmem_limit_bytes),
    )(tgt, x_p, w_t)

    loss = -jnp.mean(per_sample[:B, 0])
    return x_n[:B], preds[:B, 0], loss


def reference(x, w, t, *, scale=None, m1=1, m2=0.0, m3=0.0, eps=1e-6):
    # plain-JAX reference mirroring the PyTorch forward
    w_n = w / jnp.maximum(jnp.linalg.norm(w, axis=1, keepdims=True), 1e-12)
    norms = jnp.linalg.norm(x, axis=1, keepdims=True)
    x_n = x / norms
    cos = jnp.clip(x_n @ w_n.T, -1.0, 1.0)
    preds = jnp.argmax(cos, axis=1)
    scales = norms[:, 0] if scale is None else jnp.full((x.shape[0],), float(scale))
    angles = jnp.arccos(cos)
    numer_full = scales[:, None] * (jnp.cos(m1 * angles + m2) - m3)
    numer = numer_full[jnp.arange(x.shape[0]), t]
    onehot = jax.nn.one_hot(t, cos.shape[1], dtype=cos.dtype)
    excl = jnp.sum(jnp.exp(scales[:, None] * cos) * (1.0 - onehot), axis=1)
    denom = jnp.exp(numer) + excl
    loss = -jnp.mean(numer - jnp.log(denom + eps))
    return x_n, preds, loss


if __name__ == "__main__":
    key = jax.random.PRNGKey(0)
    k1x, k1w, k1t, k2x, k2w, k2t = jax.random.split(key, 6)

    # --- case 1: module defaults (scale=None, m2=m3=0); f32 matmul for exact checks
    B, E, C = 8, 32, 16
    x = jax.random.normal(k1x, (B, E), dtype=jnp.float32)
    fc_weight = 0.1 * jax.random.normal(k1w, (C, E), dtype=jnp.float32)
    targets = jax.random.randint(k1t, (B,), 0, C, dtype=jnp.int32)

    x_n, preds, loss = angular_margin_loss(x, fc_weight, targets,
                                           matmul_dtype=jnp.float32)
    jax.block_until_ready((x_n, preds, loss))

    rx_n, rpreds, rloss = reference(x, fc_weight, targets)
    assert jnp.allclose(x_n, rx_n, rtol=1e-5, atol=1e-5), "normalized inputs mismatch"
    assert jnp.array_equal(preds, rpreds.astype(jnp.int32)), "preds mismatch"
    assert jnp.allclose(loss, rloss, rtol=1e-5, atol=1e-5), "loss mismatch"

    # --- case 2: margins + fixed scale; multi-tile grid over batch AND classes,
    #             with batch and class padding (masking path exercised)
    B2, E2, C2 = 12, 32, 200
    x2 = jax.random.normal(k2x, (B2, E2), dtype=jnp.float32)
    w2 = 0.1 * jax.random.normal(k2w, (C2, E2), dtype=jnp.float32)
    t2 = jax.random.randint(k2t, (B2,), 0, C2, dtype=jnp.int32)

    x2_n, p2, l2 = angular_margin_loss(x2, w2, t2, scale=30.0, m2=0.2, m3=0.1,
                                       tile_b=8, tile_c=128,
                                       matmul_dtype=jnp.float32)   # grid (2, 2)
    jax.block_until_ready((x2_n, p2, l2))

    r2x, r2p, r2l = reference(x2, w2, t2, scale=30.0, m2=0.2, m3=0.1)
    assert jnp.allclose(x2_n, r2x, rtol=1e-5, atol=1e-5), "normalized inputs mismatch (2)"
    assert jnp.array_equal(p2, r2p.astype(jnp.int32)), "preds mismatch (2)"
    assert jnp.allclose(l2, r2l, rtol=1e-4, atol=1e-4), "loss mismatch (2)"

    # --- case 3: default perf path (bf16 W stream + bf16 MXU, auto tiles);
    #             loose numeric check (bf16 cos -> ~1e-3-level loss shift)
    x3_n, p3, l3 = angular_margin_loss(x, fc_weight, targets)
    jax.block_until_ready((x3_n, p3, l3))
    assert jnp.allclose(x3_n, rx_n, rtol=1e-5, atol=1e-5), "normalized inputs mismatch (3)"
    assert bool(jnp.isfinite(l3)), "non-finite loss (3)"
    assert jnp.allclose(l3, rloss, rtol=5e-2, atol=5e-2), "loss mismatch (3, bf16 path)"

    print("KERNEL_OK")
</pallas_src>

<mosaic_0001>
module attributes {stable_mosaic.version = 11 : i64} {
  func.func @_angular_margin_kernel(%arg0: i32, %arg1: i32, %arg2: memref<8x1xi32, #tpu.memory_space<vmem>>, %arg3: memref<8x32xf32, #tpu.memory_space<vmem>>, %arg4: memref<32x16xf32, #tpu.memory_space<vmem>>, %arg5: memref<8x32xf32, #tpu.memory_space<vmem>>, %arg6: memref<8x1xi32, #tpu.memory_space<vmem>>, %arg7: memref<8x1xf32, #tpu.memory_space<vmem>>, %arg8: memref<8x1xf32, #tpu.memory_space<vmem>>, %arg9: memref<8x1xf32, #tpu.memory_space<vmem>>, %arg10: memref<8x1xi32, #tpu.memory_space<vmem>>, %arg11: memref<8x1xf32, #tpu.memory_space<vmem>>, %arg12: memref<8x1xf32, #tpu.memory_space<vmem>>, %arg13: memref<8x32xf32, #tpu.memory_space<vmem>>) attributes {dimension_semantics = [#tpu.dimension_semantics<parallel>, #tpu.dimension_semantics<arbitrary>], iteration_bounds = array<i64: 1, 1>, scalar_prefetch = 0 : i64, scratch_operands = 6 : i64, tpu.core_type = #tpu.core_type<tc>, window_params = [{transform_indices = @transform_0, window_bounds = array<i64: 8, 1>}, {transform_indices = @transform_1, window_bounds = array<i64: 8, 32>}, {transform_indices = @transform_2, window_bounds = array<i64: 32, 16>}, {transform_indices = @transform_3, window_bounds = array<i64: 8, 32>}, {transform_indices = @transform_4, window_bounds = array<i64: 8, 1>}, {transform_indices = @transform_5, window_bounds = array<i64: 8, 1>}]} {
    %c0_i32 = arith.constant 0 : i32
    %0 = arith.cmpi eq, %arg1, %c0_i32 : i32
    %1 = arith.extui %0 : i1 to i32
    %c0_i32_0 = arith.constant 0 : i32
    %2 = arith.cmpi ne, %1, %c0_i32_0 : i32
    scf.if %2 {
      %c0_34 = arith.constant 0 : index
      %c0_35 = arith.constant 0 : index
      %60 = vector.load %arg3[%c0_34, %c0_35] : memref<8x32xf32, #tpu.memory_space<vmem>>, vector<8x32xf32>
      %61 = arith.mulf %60, %60 : vector<8x32xf32>
      %cst_36 = arith.constant dense<0.000000e+00> : vector<8xf32>
      %62 = vector.multi_reduction <add>, %61, %cst_36 [1] : vector<8x32xf32> to vector<8xf32>
      %63 = vector.shape_cast %62 : vector<8xf32> to vector<8x1xf32>
      %64 = math.sqrt %63 : vector<8x1xf32>
      %65 = vector.broadcast %64 : vector<8x1xf32> to vector<8x32xf32>
      %66 = arith.divf %60, %65 : vector<8x32xf32>
      %c0_37 = arith.constant 0 : index
      %c0_38 = arith.constant 0 : index
      %67 = vector.load %arg5[%c0_37, %c0_38] : memref<8x32xf32, #tpu.memory_space<vmem>>, vector<8x32xf32>
      tpu.vector_store %arg5[%c0_37, %c0_38], %66 {strides = array<i32>} : memref<8x32xf32, #tpu.memory_space<vmem>>, vector<8x32xf32>,
      %c0_39 = arith.constant 0 : index
      %c0_40 = arith.constant 0 : index
      %68 = vector.load %arg13[%c0_39, %c0_40] : memref<8x32xf32, #tpu.memory_space<vmem>>, vector<8x32xf32>
      tpu.vector_store %arg13[%c0_39, %c0_40], %66 {strides = array<i32>} : memref<8x32xf32, #tpu.memory_space<vmem>>, vector<8x32xf32>,
      %c0_41 = arith.constant 0 : index
      %c0_42 = arith.constant 0 : index
      %69 = vector.load %arg8[%c0_41, %c0_42] : memref<8x1xf32, #tpu.memory_space<vmem>>, vector<8x1xf32>
      tpu.vector_store %arg8[%c0_41, %c0_42], %64 {strides = array<i32>} : memref<8x1xf32, #tpu.memory_space<vmem>>, vector<8x1xf32>,
      %cst_43 = arith.constant -2.000000e+00 : f32
      %70 = vector.broadcast %cst_43 : f32 to vector<8x1xf32>
      %c0_44 = arith.constant 0 : index
      %c0_45 = arith.constant 0 : index
      %71 = vector.load %arg9[%c0_44, %c0_45] : memref<8x1xf32, #tpu.memory_space<vmem>>, vector<8x1xf32>
      tpu.vector_store %arg9[%c0_44, %c0_45], %70 {strides = array<i32>} : memref<8x1xf32, #tpu.memory_space<vmem>>, vector<8x1xf32>,
      %c0_i32_46 = arith.constant 0 : i32
      %72 = vector.broadcast %c0_i32_46 : i32 to vector<8x1xi32>
      %c0_47 = arith.constant 0 : index
      %c0_48 = arith.constant 0 : index
      %73 = vector.load %arg10[%c0_47, %c0_48] : memref<8x1xi32, #tpu.memory_space<vmem>>, vector<8x1xi32>
      tpu.vector_store %arg10[%c0_47, %c0_48], %72 {strides = array<i32>} : memref<8x1xi32, #tpu.memory_space<vmem>>, vector<8x1xi32>,
      %cst_49 = arith.constant 0.000000e+00 : f32
      %74 = vector.broadcast %cst_49 : f32 to vector<8x1xf32>
      %c0_50 = arith.constant 0 : index
      %c0_51 = arith.constant 0 : index
      %75 = vector.load %arg11[%c0_50, %c0_51] : memref<8x1xf32, #tpu.memory_space<vmem>>, vector<8x1xf32>
      tpu.vector_store %arg11[%c0_50, %c0_51], %74 {strides = array<i32>} : memref<8x1xf32, #tpu.memory_space<vmem>>, vector<8x1xf32>,
      %cst_52 = arith.constant 0.000000e+00 : f32
      %76 = vector.broadcast %cst_52 : f32 to vector<8x1xf32>
      %c0_53 = arith.constant 0 : index
      %c0_54 = arith.constant 0 : index
      %77 = vector.load %arg12[%c0_53, %c0_54] : memref<8x1xf32, #tpu.memory_space<vmem>>, vector<8x1xf32>
      tpu.vector_store %arg12[%c0_53, %c0_54], %76 {strides = array<i32>} : memref<8x1xf32, #tpu.memory_space<vmem>>, vector<8x1xf32>,
    } else {
    }
    %c0 = arith.constant 0 : index
    %c0_1 = arith.constant 0 : index
    %3 = vector.load %arg13[%c0, %c0_1] : memref<8x32xf32, #tpu.memory_space<vmem>>, vector<8x32xf32>
    %c0_2 = arith.constant 0 : index
    %c0_3 = arith.constant 0 : index
    %4 = vector.load %arg8[%c0_2, %c0_3] : memref<8x1xf32, #tpu.memory_space<vmem>>, vector<8x1xf32>
    %c0_4 = arith.constant 0 : index
    %c0_5 = arith.constant 0 : index
    %5 = vector.load %arg4[%c0_4, %c0_5] : memref<32x16xf32, #tpu.memory_space<vmem>>, vector<32x16xf32>
    %cst = arith.constant dense<0.000000e+00> : vector<8x16xf32>
    %6 = tpu.matmul %3, %5, %cst {dimension_numbers = #tpu.dot_dimension_numbers<[1], [0], [0], [1], [0, 0, 1, 1], [], []>} : vector<8x32xf32>, vector<32x16xf32>, vector<8x16xf32> -> vector<8x16xf32>
    %cst_6 = arith.constant -1.000000e+00 : f32
    %cst_7 = arith.constant 1.000000e+00 : f32
    %7 = vector.broadcast %cst_6 : f32 to vector<8x16xf32>
    %8 = arith.maximumf %7, %6 : vector<8x16xf32>
    %9 = vector.broadcast %cst_7 : f32 to vector<8x16xf32>
    %10 = arith.minimumf %9, %8 : vector<8x16xf32>
    %c16_i32 = arith.constant 16 : i32
    %11 = arith.muli %arg1, %c16_i32 : i32
    %12 = tpu.iota {dimensions = array<i32: 1>} : vector<8x16xi32>
    %cst_8 = arith.constant dense<0xFF800000> : vector<8xf32>
    %13 = vector.multi_reduction <maximumf>, %10, %cst_8 [1] : vector<8x16xf32> to vector<8xf32>
    %14 = vector.shape_cast %13 : vector<8xf32> to vector<8x1xf32>
    %15 = vector.broadcast %14 : vector<8x1xf32> to vector<8x16xf32>
    %16 = arith.cmpf oeq, %10, %15 : vector<8x16xf32>
    %c16_i32_9 = arith.constant 16 : i32
    %17 = vector.broadcast %c16_i32_9 : i32 to vector<8x16xi32>
    %18 = arith.select %16, %12, %17 : vector<8x16xi1>, vector<8x16xi32>
    %cst_10 = arith.constant dense<2147483647> : vector<8xi32>
    %19 = vector.multi_reduction <minsi>, %18, %cst_10 [1] : vector<8x16xi32> to vector<8xi32>
    %20 = vector.shape_cast %19 : vector<8xi32> to vector<8x1xi32>
    %21 = vector.broadcast %11 : i32 to vector<8x1xi32>
    %22 = arith.addi %20, %21 : vector<8x1xi32>
    %c0_11 = arith.constant 0 : index
    %c0_12 = arith.constant 0 : index
    %23 = vector.load %arg9[%c0_11, %c0_12] : memref<8x1xf32, #tpu.memory_space<vmem>>, vector<8x1xf32>
    %24 = arith.cmpf ogt, %14, %23 : vector<8x1xf32>
    %25 = arith.maximumf %23, %14 : vector<8x1xf32>
    %c0_13 = arith.constant 0 : index
    %c0_14 = arith.constant 0 : index
    %26 = vector.load %arg10[%c0_13, %c0_14] : memref<8x1xi32, #tpu.memory_space<vmem>>, vector<8x1xi32>
    %27 = arith.select %24, %22, %26 : vector<8x1xi1>, vector<8x1xi32>
    %c0_15 = arith.constant 0 : index
    %c0_16 = arith.constant 0 : index
    %28 = vector.load %arg10[%c0_15, %c0_16] : memref<8x1xi32, #tpu.memory_space<vmem>>, vector<8x1xi32>
    tpu.vector_store %arg10[%c0_15, %c0_16], %27 {strides = array<i32>} : memref<8x1xi32, #tpu.memory_space<vmem>>, vector<8x1xi32>,
    %c0_17 = arith.constant 0 : index
    %c0_18 = arith.constant 0 : index
    %29 = vector.load %arg9[%c0_17, %c0_18] : memref<8x1xf32, #tpu.memory_space<vmem>>, vector<8x1xf32>
    tpu.vector_store %arg9[%c0_17, %c0_18], %25 {strides = array<i32>} : memref<8x1xf32, #tpu.memory_space<vmem>>, vector<8x1xf32>,
    %30 = arith.mulf %4, %25 : vector<8x1xf32>
    %31 = vector.broadcast %4 : vector<8x1xf32> to vector<8x16xf32>
    %32 = arith.mulf %31, %10 : vector<8x16xf32>
    %33 = vector.broadcast %30 : vector<8x1xf32> to vector<8x16xf32>
    %34 = arith.subf %32, %33 : vector<8x16xf32>
    %35 = math.exp %34 : vector<8x16xf32>
    %cst_19 = arith.constant dense<0.000000e+00> : vector<8xf32>
    %36 = vector.multi_reduction <add>, %35, %cst_19 [1] : vector<8x16xf32> to vector<8xf32>
    %37 = vector.shape_cast %36 : vector<8xf32> to vector<8x1xf32>
    %c0_20 = arith.constant 0 : index
    %c0_21 = arith.constant 0 : index
    %38 = vector.load %arg12[%c0_20, %c0_21] : memref<8x1xf32, #tpu.memory_space<vmem>>, vector<8x1xf32>
    %39 = arith.mulf %4, %23 : vector<8x1xf32>
    %40 = arith.subf %39, %30 : vector<8x1xf32>
    %41 = math.exp %40 : vector<8x1xf32>
    %42 = arith.mulf %38, %41 : vector<8x1xf32>
    %43 = arith.addf %42, %37 : vector<8x1xf32>
    %c0_22 = arith.constant 0 : index
    %c0_23 = arith.constant 0 : index
    %44 = vector.load %arg12[%c0_22, %c0_23] : memref<8x1xf32, #tpu.memory_space<vmem>>, vector<8x1xf32>
    tpu.vector_store %arg12[%c0_22, %c0_23], %43 {strides = array<i32>} : memref<8x1xf32, #tpu.memory_space<vmem>>, vector<8x1xf32>,
    %c0_24 = arith.constant 0 : index
    %c0_25 = arith.constant 0 : index
    %45 = vector.load %arg2[%c0_24, %c0_25] : memref<8x1xi32, #tpu.memory_space<vmem>>, vector<8x1xi32>
    %46 = vector.broadcast %11 : i32 to vector<8x1xi32>
    %47 = arith.subi %45, %46 : vector<8x1xi32>
    %48 = vector.broadcast %47 : vector<8x1xi32> to vector<8x16xi32>
    %49 = arith.cmpi eq, %12, %48 : vector<8x16xi32>
    %c0_26 = arith.constant 0 : index
    %c0_27 = arith.constant 0 : index
    %50 = vector.load %arg11[%c0_26, %c0_27] : memref<8x1xf32, #tpu.memory_space<vmem>>, vector<8x1xf32>
    %cst_28 = arith.constant 0.000000e+00 : f32
    %51 = vector.broadcast %cst_28 : f32 to vector<8x16xf32>
    %52 = arith.select %49, %10, %51 : vector<8x16xi1>, vector<8x16xf32>
    %cst_29 = arith.constant dense<0.000000e+00> : vector<8xf32>
    %53 = vector.multi_reduction <add>, %52, %cst_29 [1] : vector<8x16xf32> to vector<8xf32>
    %54 = vector.shape_cast %53 : vector<8xf32> to vector<8x1xf32>
    %55 = arith.addf %50, %54 : vector<8x1xf32>
    %c0_30 = arith.constant 0 : index
    %c0_31 = arith.constant 0 : index
    %56 = vector.load %arg11[%c0_30, %c0_31] : memref<8x1xf32, #tpu.memory_space<vmem>>, vector<8x1xf32>
    tpu.vector_store %arg11[%c0_30, %c0_31], %55 {strides = array<i32>} : memref<8x1xf32, #tpu.memory_space<vmem>>, vector<8x1xf32>,
    %c0_i32_32 = arith.constant 0 : i32
    %57 = arith.cmpi eq, %arg1, %c0_i32_32 : i32
    %58 = arith.extui %57 : i1 to i32
    %c0_i32_33 = arith.constant 0 : i32
    %59 = arith.cmpi ne, %58, %c0_i32_33 : i32
    scf.if %59 {
      %c0_34 = arith.constant 0 : index
      %c0_35 = arith.constant 0 : index
      %60 = vector.load %arg10[%c0_34, %c0_35] : memref<8x1xi32, #tpu.memory_space<vmem>>, vector<8x1xi32>
      %c0_36 = arith.constant 0 : index
      %c0_37 = arith.constant 0 : index
      %61 = vector.load %arg6[%c0_36, %c0_37] : memref<8x1xi32, #tpu.memory_space<vmem>>, vector<8x1xi32>
      tpu.vector_store %arg6[%c0_36, %c0_37], %60 {strides = array<i32>} : memref<8x1xi32, #tpu.memory_space<vmem>>, vector<8x1xi32>,
      %c0_38 = arith.constant 0 : index
      %c0_39 = arith.constant 0 : index
      %62 = vector.load %arg11[%c0_38, %c0_39] : memref<8x1xf32, #tpu.memory_space<vmem>>, vector<8x1xf32>
      %c0_40 = arith.constant 0 : index
      %c0_41 = arith.constant 0 : index
      %63 = vector.load %arg8[%c0_40, %c0_41] : memref<8x1xf32, #tpu.memory_space<vmem>>, vector<8x1xf32>
      %c0_42 = arith.constant 0 : index
      %c0_43 = arith.constant 0 : index
      %64 = vector.load %arg9[%c0_42, %c0_43] : memref<8x1xf32, #tpu.memory_space<vmem>>, vector<8x1xf32>
      %65 = arith.mulf %63, %62 : vector<8x1xf32>
      %66 = arith.mulf %63, %64 : vector<8x1xf32>
      %c0_44 = arith.constant 0 : index
      %c0_45 = arith.constant 0 : index
      %67 = vector.load %arg12[%c0_44, %c0_45] : memref<8x1xf32, #tpu.memory_space<vmem>>, vector<8x1xf32>
      %68 = arith.mulf %63, %62 : vector<8x1xf32>
      %69 = arith.subf %68, %66 : vector<8x1xf32>
      %70 = math.exp %69 : vector<8x1xf32>
      %71 = arith.subf %67, %70 : vector<8x1xf32>
      %cst_46 = arith.constant 0.000000e+00 : f32
      %72 = vector.broadcast %cst_46 : f32 to vector<8x1xf32>
      %73 = arith.maximumf %71, %72 : vector<8x1xf32>
      %74 = arith.subf %65, %66 : vector<8x1xf32>
      %75 = math.exp %74 : vector<8x1xf32>
      %76 = arith.addf %75, %73 : vector<8x1xf32>
      %cst_47 = arith.constant 0.000000e+00 : f32
      %77 = vector.broadcast %cst_47 : f32 to vector<8x1xf32>
      %78 = arith.subf %77, %66 : vector<8x1xf32>
      %79 = math.exp %78 : vector<8x1xf32>
      %cst_48 = arith.constant 9.99999997E-7 : f32
      %80 = vector.broadcast %cst_48 : f32 to vector<8x1xf32>
      %81 = arith.mulf %80, %79 : vector<8x1xf32>
      %82 = arith.addf %76, %81 : vector<8x1xf32>
      %83 = math.log %82 : vector<8x1xf32>
      %84 = arith.addf %66, %83 : vector<8x1xf32>
      %85 = arith.subf %65, %84 : vector<8x1xf32>
      %c0_49 = arith.constant 0 : index
      %c0_50 = arith.constant 0 : index
      %86 = vector.load %arg7[%c0_49, %c0_50] : memref<8x1xf32, #tpu.memory_space<vmem>>, vector<8x1xf32>
      tpu.vector_store %arg7[%c0_49, %c0_50], %85 {strides = array<i32>} : memref<8x1xf32, #tpu.memory_space<vmem>>, vector<8x1xf32>,
    } else {
    }
    return
  }
  func.func @transform_0(%arg0: i32, %arg1: i32) -> (i32, i32) {
    %c0_i32 = arith.constant 0 : i32
    %c0_i32_0 = arith.constant 0 : i32
    return %arg0, %c0_i32 : i32, i32
  }
  func.func @transform_1(%arg0: i32, %arg1: i32) -> (i32, i32) {
    %c0_i32 = arith.constant 0 : i32
    %c0_i32_0 = arith.constant 0 : i32
    return %arg0, %c0_i32 : i32, i32
  }
  func.func @transform_2(%arg0: i32, %arg1: i32) -> (i32, i32) {
    %c0_i32 = arith.constant 0 : i32
    %c0_i32_0 = arith.constant 0 : i32
    return %c0_i32, %arg1 : i32, i32
  }
  func.func @transform_3(%arg0: i32, %arg1: i32) -> (i32, i32) {
    %c0_i32 = arith.constant 0 : i32
    %c0_i32_0 = arith.constant 0 : i32
    return %arg0, %c0_i32 : i32, i32
  }
  func.func @transform_4(%arg0: i32, %arg1: i32) -> (i32, i32) {
    %c0_i32 = arith.constant 0 : i32
    %c0_i32_0 = arith.constant 0 : i32
    return %arg0, %c0_i32 : i32, i32
  }
  func.func @transform_5(%arg0: i32, %arg1: i32) -> (i32, i32) {
    %c0_i32 = arith.constant 0 : i32
    %c0_i32_0 = arith.constant 0 : i32
    return %arg0, %c0_i32 : i32, i32
  }
}

</mosaic_0001>

<bundles_post_ra>
// kernel: tpu_custom_call.1
= control target key start
LH: loop header
LB: loop body
LE: loop exit
PB: predicated region body
PF: predicated region fallthrough
CT: control target
= control target key end

     0   :  { %vm24_vm0 = vcmask 261120   ;;  %s365_s0 = inlined_call_operand.vmem [shape: s32[8,1], index: 0, kind: input, shape index: {}]   ;;  %s366_s1 = inlined_call_operand.vmem [shape: f32[8,32], index: 1, kind: input, shape index: {}]   ;;  %s367_s2 = inlined_call_operand.vmem [shape: f32[32,16], index: 2, kind: input, shape index: {}]   ;;  %s368_s3 = inlined_call_operand.hbm [shape: f32[8,32], index: 3, kind: output, shape index: {0}]   ;;  %s369_s4 = inlined_call_operand.vmem [shape: s32[8,1], index: 4, kind: output, shape index: {1}]   ;;  %s370_s5 = inlined_call_operand.vmem [shape: f32[8,1], index: 5, kind: output, shape index: {2}]  }
   0x1   :  { %v22_v0 = vld [vmem:[%s366_s1] sm:$0xff] }
   0x2   :  { %11 = vsyncpa [#allocation9], 0  ;;  %v23_v1 = vmul.f32 %v22_v0, %v22_v0  ;;  %vm57_vm1 = vcmask 7168   ;;  %v268_v3 = vmov 0   ;;  %v155_v4 = vld [vmem:[%s365_s0] sm:$0xff]  ;;  %v269_v5 = vmov -2.0  }
   0x3   :  { %225 = vset.pattern.permute.xlu1 %v268_v3  ;;  %60 = vst.msk [vmem:[#allocation4] sm:$0xff] %vm57_vm1, %v268_v3  ;;  %226 = vset.pattern.permute.xlu2 %v268_v3  ;;  %v68_v10 = vld [vmem:[%s367_s2 + $0x18] sm:$0xff]  ;;  %v67_v11 = vld [vmem:[%s367_s2 + $0x10] sm:$0xff]  ;;  %v66_v13 = vld [vmem:[%s367_s2 + $0x8] sm:$0xff]  ;;  %v96_v34 = vlaneseq  ;;  %vm98_vm8 = vcmask 130048   ;;  %v270_v42 = vmov 0.0  }
   0x4   :  { %v25_v2 = vsel %vm24_vm0, %v23_v1, 0.0  ;;  %158 = vperm.xlu1 %225, %v155_v4   ;;  %59 = vst.msk [vmem:[#allocation3] sm:$0xff] %vm57_vm1, %v269_v5  ;;  %227 = vset.pattern.permute.xlu0 %v268_v3  ;;  %v65_v15 = vld [vmem:[%s367_s2] sm:$0xff]  ;;  %s271_s2 = smov [#allocation8]   ;;  %s202_s6 = sshll.u32 %s368_s3, 4  ;;  %s203_s6 = int_to_ptr.hbm [resolvable:$true] %s202_s6 }
   0x5   :  { %26 = vadd.xlane.f32.xlu0 %v25_v2  ;;  %85 = vmatpush.msra.mxu0 %v68_v10  ;;  %v97_v36 = vand.u32 127, %v96_v34  ;;  %61 = vst.msk [vmem:[#allocation5] sm:$0xff] %vm57_vm1, %v270_v42  ;;  %s200_s28 = sshll.u32 %s271_s2, 4  ;;  %s201_s28 = int_to_ptr.vmem [resolvable:$true] %s200_s28 }
   0x6   :  { %62 = vst.msk [vmem:[#allocation6] sm:$0xff] %vm57_vm1, %v270_v42 }
   0x7   :  { %86 = vmatpush.msra.mxu0 %v67_v11 }
   0x9   :  { %87 = vmatpush.msra.mxu0 %v66_v13 }
   0xb   :  { %88 = vmatpush.msra.mxu0 %v65_v15  ;;  %v334_v43 = vld [vmem:[#allocation3] sm:$0xff] }
   0xc   :  { %v161_v47 = vld [vmem:[#allocation5] sm:$0xff] }
   0xd   :  { %v147_v10 = vld [vmem:[#allocation6] sm:$0xff] }
  0x76   :  { %v159_v39 = vpop.permute.xlu1 %158 }
  0x77   :  { %vm160_vm9 = vcmp.eq.s32.totalorder %v97_v36, %v159_v39 }
  0x78   :  { %v27_v6 = vpop.xlane.xlu0 %26 }
  0x79   :  { %228 = vrsqrt.f32 %v27_v6  ;;  %vm35_vm2 = vcmp.eq.f32.partialorder %v27_v6, inf  ;;  %v38_v18 = vand.u32 2147483648, %v27_v6  ;;  %vm37_vm3 = vcmp.eq.f32.partialorder %v27_v6, 0.0 }
  0x7f   :  { %v229_v7 = vpop.eup %228 }
  0x80   :  { %v29_v8 = vmul.f32 %v229_v7, %v27_v6 }
  0x82   :  { %v30_v9 = vmul.f32 %v229_v7, %v29_v8 }
  0x84   :  { %v31_v12 = vmul.f32 0.5, %v30_v9 }
  0x86   :  { %v32_v14 = vsub.f32 1.5, %v31_v12 }
  0x88   :  { %v33_v16 = vmul.f32 %v229_v7, %v32_v14 }
  0x8a   :  { %v34_v17 = vmul.f32 %v33_v16, %v27_v6 }
  0x8c   :  { %v36_v19 = vsel %vm35_vm2, %v27_v6, %v34_v17 }
  0x8d   :  { %v39_v20 = vsel %vm37_vm3, %v38_v18, %v36_v19 }
  0x8e   :  { %230 = vrcp.f32 %v39_v20  ;;  %58 = vst.msk [vmem:[#allocation2] sm:$0xff] %vm57_vm1, %v39_v20  ;;  %v51_v25 = vand.u32 2147483648, %v39_v20  ;;  %v49_v27 = vand.u32 2147483647, %v39_v20  ;;  %vm45_vm5 = vweird.f32 %v39_v20 }
  0x90   :  { %v52_v29 = vor.u32 1.1754944e-38, %v51_v25  ;;  %vm50_vm7 = vcmp.eq.f32.partialorder %v49_v27, 8.507059e+37 }
  0x94   :  { %v231_v21 = vpop.eup %230 }
  0x95   :  { %v41_v22 = vmul.f32 %v231_v21, %v39_v20  ;;  %v324_v23 = vld [vmem:[#allocation2] sm:$0xff]  ;;  %vm46_vm4 = vweird.f32 %v231_v21 }
  0x96   :  { %132 = vperm.xlu1 %225, %v324_v23   ;;  %vm47_vm6 = vmor %vm45_vm5, %vm46_vm4  ;;  %v148_v1 = vmul.f32 %v334_v43, %v324_v23 }
  0x97   :  { %v42_v24 = vsub.f32 1.0, %v41_v22 }
  0x99   :  { %v43_v26 = vmul.f32 %v231_v21, %v42_v24 }
  0x9b   :  { %v44_v28 = vadd.f32 %v231_v21, %v43_v26 }
  0x9d   :  { %v48_v30 = vsel %vm47_vm6, %v231_v21, %v44_v28 }
  0x9e   :  { %v53_v31 = vsel %vm50_vm7, %v52_v29, %v48_v30 }
  0x9f   :  { %v54_v32 = vmul.f32 %v53_v31, %v22_v0 }
  0xa1   :  { %56 = vst.msk [vmem:[#allocation7] sm:$0xff] %vm24_vm0, %v54_v32 }
  0xa2   :  { %55 = vst.msk [vmem:[#allocation8] sm:$0xff] %vm24_vm0, %v54_v32 }
  0xa3   :  { %205 = dma.vmem_to_hbm [thread:$0]  %s201_s28, 128, %s203_s6, [#allocation9]  }
  0xa8   :  { %v63_v33 = vld [vmem:[#allocation7] sm:$0xff] }
  0xa9   :  { %219 = vmatmul.msk.f32.vlgmr.msra.gmra.mxu0 %vm24_vm0, %v63_v33  ;;  %v124_v33 = vld [vmem:[#allocation4] sm:$0xff] }
 0x108   :  { %v133_v54 = vpop.permute.xlu1 %132 }
 0x126   :  { %v90_v35 = vpop.f32.mrf.mxu0 }
 0x127   :  { %v220_v37 = vclamps-f32 %v90_v35, 1.0 }
 0x129   :  { %v99_v38 = vsel %vm98_vm8, %v220_v37, -inf  ;;  %v162_v40 = vsel %vm160_vm9, %v220_v37, 0.0  ;;  %v135_v55 = vmul.f32 %v220_v37, %v133_v54 }
 0x12a   :  { %100 = vmax.xlane.f32.xlu0 %v99_v38  ;;  %v163_v41 = vsel %vm98_vm8, %v162_v40, 0.0 }
 0x132   :  { %164 = vadd.xlane.f32.xlu0 %v163_v41 }
 0x19d   :  { %v336_v44 = vpop.xlane.xlu0 %100 }
 0x19e   :  { %v123_v45 = vmax.f32 %v334_v43, %v336_v44  ;;  %vm102_vm10 = vcmp.eq.f32.partialorder %v220_v37, %v336_v44  ;;  %vm122_vm12 = vcmp.gt.f32.partialorder %v336_v44, %v334_v43 }
 0x19f   :  { %v103_v50 = vsel %vm102_vm10, %v97_v36, 16 }
 0x1a0   :  { %v129_v46 = vmul.f32 %v123_v45, %v324_v23  ;;  %128 = vst.msk [vmem:[#allocation3] sm:$0xff] %vm57_vm1, %v123_v45  ;;  %v104_v51 = vsel %vm98_vm8, %v103_v50, 2147483647 }
 0x1a1   :  { %v106_v52 = vshra.s32 %v104_v51, 16  ;;  %v105_v61 = vand.u32 65535, %v104_v51 }
 0x1a2   :  { %138 = vperm.xlu2 %226, %v129_v46   ;;  %v149_v2 = vsub.f32 %v148_v1, %v129_v46 }
 0x1a3   :  { %v108_v53 = vcvt.s32.f32 %v106_v52  ;;  %v107_v63 = vcvt.s32.f32 %v105_v61 }
 0x1a4   :  { %v150_v3 = vmul.f32 1.442695, %v149_v2 }
 0x1a5   :  { %v165_v48 = vpop.xlane.xlu0 %164 }
 0x1a6   :  { %v166_v49 = vadd.f32 %v165_v48, %v161_v47 }
 0x1a7   :  { %v175_v5 = vld [vmem:[#allocation3] sm:$0xff] }
 0x1a8   :  { %167 = vst.msk [vmem:[#allocation5] sm:$0xff] %vm57_vm1, %v166_v49  ;;  %v177_v7 = vmul.f32 %v175_v5, %v324_v23 }
 0x1aa   :  { %v185_v11 = vsub.f32 0.0, %v177_v7 }
 0x1ac   :  { %v186_v16 = vmul.f32 1.442695, %v185_v11 }
 0x1af   :  { %v173_v4 = vld [vmem:[#allocation5] sm:$0xff] }
 0x1b0   :  { %v176_v6 = vmul.f32 %v173_v4, %v324_v23 }
 0x1b2   :  { %v179_v9 = vsub.f32 %v176_v6, %v177_v7 }
 0x1b4   :  { %v180_v13 = vmul.f32 1.442695, %v179_v9 }
 0x1cb   :  { %109 = vmin.xlane.f32.xlu2 %v108_v53 }
 0x1fc   :  { %v139_v56 = vpop.permute.xlu2 %138 }
 0x1fd   :  { %v141_v57 = vsub.f32 %v135_v55, %v139_v56 }
 0x1ff   :  { %v142_v58 = vmul.f32 1.442695, %v141_v57 }
 0x201   :  { %232 = vpow2.f32 %v142_v58 }
 0x202   :  { %234 = vpow2.f32 %v150_v3 }
 0x203   :  { %236 = vpow2.f32 %v180_v13 }
 0x204   :  { %238 = vpow2.f32 %v186_v16 }
 0x207   :  { %v233_v59 = vpop.eup %232 }
 0x208   :  { %v144_v60 = vsel %vm98_vm8, %v233_v59, 0.0  ;;  %v235_v8 = vpop.eup %234 }
 0x209   :  { %145 = vadd.xlane.f32.xlu1 %v144_v60  ;;  %v152_v12 = vmul.f32 %v235_v8, %v147_v10  ;;  %v237_v17 = vpop.eup %236 }
 0x20a   :  { %v239_v20 = vpop.eup %238 }
 0x20b   :  { %v188_v23 = vmul.f32 1e-06, %v239_v20 }
 0x23e   :  { %v110_v62 = vpop.xlane.xlu2 %109 }
 0x23f   :  { %vm111_vm11 = vcmp.eq.f32.partialorder %v108_v53, %v110_v62  ;;  %v116_v29 = vcvt.f32.s32 %v110_v62 }
 0x240   :  { %v112_v0 = vsel %vm111_vm11, %v107_v63, inf }
 0x241   :  { %113 = vmin.xlane.f32.xlu0 %v112_v0  ;;  %v117_v31 = vshll.u32 %v116_v29, 16 }
 0x27c   :  { %v146_v14 = vpop.xlane.xlu1 %145 }
 0x27d   :  { %v153_v15 = vadd.f32 %v152_v12, %v146_v14 }
 0x27f   :  { %154 = vst.msk [vmem:[#allocation6] sm:$0xff] %vm57_vm1, %v153_v15 }
 0x286   :  { %v178_v18 = vld [vmem:[#allocation6] sm:$0xff] }
 0x287   :  { %v182_v19 = vsub.f32 %v178_v18, %v237_v17 }
 0x289   :  { %v183_v21 = vmax.f32 %v182_v19, 0.0 }
 0x28b   :  { %v184_v22 = vadd.f32 %v237_v17, %v183_v21 }
 0x28d   :  { %v189_v24 = vadd.f32 %v188_v23, %v184_v22 }
 0x28f   :  { %240 = vlog2.f32 %v189_v24 }
 0x295   :  { %v241_v25 = vpop.eup %240 }
 0x296   :  { %v191_v26 = vmul.f32 0.6931472, %v241_v25 }
 0x298   :  { %v192_v27 = vadd.f32 %v191_v26, %v177_v7 }
 0x29a   :  { %v193_v28 = vsub.f32 %v176_v6, %v192_v27 }
 0x29c   :  { %194 = vst.msk [vmem:[%s370_s5] sm:$0xff] %vm57_vm1, %v193_v28 }
 0x2b4   :  { %v114_v30 = vpop.xlane.xlu0 %113 }
 0x2b5   :  { %v115_v32 = vcvt.f32.s32 %v114_v30 }
 0x2b7   :  { %v118_v34 = vadd.s32 %v117_v31, %v115_v32 }
 0x2b9   :  { %v125_v35 = vsel %vm122_vm12, %v118_v34, %v124_v33 }
 0x2ba   :  { %127 = vst.msk [vmem:[#allocation4] sm:$0xff] %vm57_vm1, %v125_v35 }
 0x2c1   :  { %v171_v36 = vld [vmem:[#allocation4] sm:$0xff] }
 0x2c2   :  { %172 = vst.msk [vmem:[%s369_s4] sm:$0xff] %vm57_vm1, %v171_v36 }
 0x2c3   :  { %266 = dma.done.wait [#allocation9], 128  }
 0x2c4   :  { %267 = vsyncadd [#allocation9], 4294967168 }
 0x2c5   :  { %218 = vsyncpa [#allocation9], 1 }

</bundles_post_ra>
